<compile_context>
chip_gen: v7x
topology: tpu7x:2x2x1
jax: 0.10.0
libtpu: 0.0.40
codegen_flags: <defaults>
</compile_context>

<pallas_src>
import math
import numpy as np
import jax
import jax.numpy as jnp
from jax.experimental import pallas as pl
from jax.experimental.pallas import tpu as pltpu


# ------------------------------- helpers --------------------------------------

def _round_up(x, m):
    return ((x + m - 1) // m) * m


def _silu(x):
    return x * jax.nn.sigmoid(x)


# ----------------------------- fused kernel -----------------------------------

def _make_fused_kernel(n_node, n_graph, b_pad, tile_n, compute_dtype):
    """Fused kernel body. Argument layout (in order):
       inputs : batch_ids[1,TILE_N], x[TILE_N,F],
                (w1,w2) per node head, W3_node_all              (if n_node)
                ws1, ws2, (wh1,wh2) per graph head, W3_graph_all (if n_graph)
       outputs: node_out[TILE_N,NODE_PAD] (if n_node),
                graph_out[B_pad,GRAPH_PAD] (if n_graph)
       scratch: acc_sum[B_pad,F], acc_cnt[B_pad,1]              (if n_graph)
    """

    def kernel(*args):
        pos = 0
        batch_ref = args[pos]; pos += 1
        x_ref = args[pos]; pos += 1

        node_w = []
        for _ in range(n_node):
            node_w.append((args[pos], args[pos + 1])); pos += 2
        if n_node:
            w3n_ref = args[pos]; pos += 1
        if n_graph:
            ws1_ref = args[pos]; ws2_ref = args[pos + 1]; pos += 2
            graph_w = []
            for _ in range(n_graph):
                graph_w.append((args[pos], args[pos + 1])); pos += 2
            w3g_ref = args[pos]; pos += 1
        if n_node:
            node_out_ref = args[pos]; pos += 1
        if n_graph:
            graph_out_ref = args[pos]; pos += 1
            acc_sum_ref = args[pos]; acc_cnt_ref = args[pos + 1]; pos += 2

        step = pl.program_id(0)
        nsteps = pl.num_programs(0)
        x = x_ref[...]                                        # [TILE_N, F]

        # ---- global mean pool: accumulate per-graph sums & counts across tiles ----
        if n_graph:
            @pl.when(step == 0)
            def _init():
                acc_sum_ref[...] = jnp.zeros_like(acc_sum_ref)
                acc_cnt_ref[...] = jnp.zeros_like(acc_cnt_ref)

            gids = jax.lax.broadcasted_iota(jnp.int32, (b_pad, tile_n), 0)
            onehot = (gids == batch_ref[...]).astype(compute_dtype)   # [B_pad, TILE_N]
            acc_sum_ref[...] += jnp.dot(onehot, x,
                                        preferred_element_type=jnp.float32)
            acc_cnt_ref[...] += jnp.sum(onehot.astype(jnp.float32),
                                        axis=-1, keepdims=True)

        # ---- node heads: per-tile 3-layer MLP, one lane-dense wide store ----
        if n_node:
            hidden = []
            for w1_ref, w2_ref in node_w:
                h = _silu(jnp.dot(x, w1_ref[...],
                                  preferred_element_type=jnp.float32))
                h = _silu(jnp.dot(h.astype(compute_dtype), w2_ref[...],
                                  preferred_element_type=jnp.float32))
                hidden.append(h.astype(compute_dtype))
            h_all = hidden[0] if len(hidden) == 1 else jnp.concatenate(hidden, -1)
            node_out_ref[...] = jnp.dot(
                h_all, w3n_ref[...],
                preferred_element_type=jnp.float32).astype(node_out_ref.dtype)

        # ---- graph heads: finalize pooling, shared MLP once, then all heads ----
        if n_graph:
            @pl.when(step == nsteps - 1)
            def _finalize():
                # clamp matches torch_scatter's mean (empty graph -> 0, not NaN)
                counts = jnp.maximum(acc_cnt_ref[...], 1.0)
                inv = pl.reciprocal(counts, approx=True)      # EUP seed ...
                inv = inv * (2.0 - counts * inv)              # ... + 1 Newton step
                g = (acc_sum_ref[...] * inv).astype(compute_dtype)    # [B_pad, F]

                h = _silu(jnp.dot(g, ws1_ref[...],
                                  preferred_element_type=jnp.float32))
                h = _silu(jnp.dot(h.astype(compute_dtype), ws2_ref[...],
                                  preferred_element_type=jnp.float32))
                h = h.astype(compute_dtype)

                hidden = []
                for wh1_ref, wh2_ref in graph_w:
                    t = _silu(jnp.dot(h, wh1_ref[...],
                                      preferred_element_type=jnp.float32))
                    t = _silu(jnp.dot(t.astype(compute_dtype), wh2_ref[...],
                                      preferred_element_type=jnp.float32))
                    hidden.append(t.astype(compute_dtype))
                h_all = (hidden[0] if len(hidden) == 1
                         else jnp.concatenate(hidden, -1))
                graph_out_ref[...] = jnp.dot(
                    h_all, w3g_ref[...],
                    preferred_element_type=jnp.float32).astype(graph_out_ref.dtype)

    return kernel


# --------------------------- weight preprocessing ------------------------------

def prepare_fused_params(params, head_type, head_dims, num_scalar, feat_dim,
                         compute_dtype=jnp.float32):
    """One-time weight prep: embed scalar-only first layers into full-width rows
    (zero pad -> no input slicing needed) and concatenate all head final-layer
    weights into one lane-dense [*, 128-multiple] matrix per head category."""
    for t in head_type:
        if t not in ("node", "graph"):
            raise ValueError(f"Unknown head type: {t}")
    node_idx = [i for i, t in enumerate(head_type) if t == "node"]
    graph_idx = [i for i, t in enumerate(head_type) if t == "graph"]

    def _pad_rows(w, rows):
        wp = jnp.zeros((rows, w.shape[1]), dtype=jnp.float32)
        return wp.at[: w.shape[0], :].set(w)

    flat = []
    meta = {"n_node": len(node_idx), "n_graph": len(graph_idx),
            "node_idx": node_idx, "graph_idx": graph_idx}

    if node_idx:
        dims = [int(head_dims[i]) for i in node_idx]
        node_pad = _round_up(max(sum(dims), 1), 128)
        h2_rows = []
        for i in node_idx:
            w1, w2, w3 = params["heads"][i]
            flat.append(_pad_rows(w1, feat_dim).astype(compute_dtype))
            flat.append(w2.astype(compute_dtype))
            h2_rows.append(w3.shape[0])
        w3_all = jnp.zeros((sum(h2_rows), node_pad), dtype=jnp.float32)
        r = c = 0
        for i in node_idx:
            w3 = params["heads"][i][2]
            w3_all = w3_all.at[r:r + w3.shape[0], c:c + w3.shape[1]].set(w3)
            r += w3.shape[0]; c += w3.shape[1]
        flat.append(w3_all.astype(compute_dtype))
        meta["node_pad"] = node_pad

    if graph_idx:
        dims = [int(head_dims[i]) for i in graph_idx]
        graph_pad = _round_up(max(sum(dims), 1), 128)
        ws1, ws2 = params["graph_shared"]
        flat.append(_pad_rows(ws1, feat_dim).astype(compute_dtype))
        flat.append(ws2.astype(compute_dtype))
        h2_rows = []
        for i in graph_idx:
            wh1, wh2, wh3 = params["heads"][i]
            flat.append(wh1.astype(compute_dtype))
            flat.append(wh2.astype(compute_dtype))
            h2_rows.append(wh3.shape[0])
        w3_all = jnp.zeros((sum(h2_rows), graph_pad), dtype=jnp.float32)
        r = c = 0
        for i in graph_idx:
            wh3 = params["heads"][i][2]
            w3_all = w3_all.at[r:r + wh3.shape[0], c:c + wh3.shape[1]].set(wh3)
            r += wh3.shape[0]; c += wh3.shape[1]
        flat.append(w3_all.astype(compute_dtype))
        meta["graph_pad"] = graph_pad

    return [jnp.asarray(w) for w in flat], meta


# ------------------------------ fused forward ----------------------------------

def multihead_decoder_forward(node_features, batch_ids, num_graphs,
                              flat_weights, meta, head_type, head_dims,
                              compute_dtype=jnp.float32):
    """Forward of MultiheadDecoderBlock as a single fused pallas_call."""
    N, F = node_features.shape
    n_node, n_graph = meta["n_node"], meta["n_graph"]

    # ---- node-tile geometry ----
    tile_n = _round_up(N, 8) if N <= 512 else 512
    n_pad = _round_up(N, tile_n)
    n_tiles = n_pad // tile_n
    b_pad = _round_up(max(int(num_graphs), 1), 8)

    x = node_features.astype(compute_dtype)
    batch2d = batch_ids.astype(jnp.int32).reshape(1, N)
    if n_pad != N:
        x = jnp.pad(x, ((0, n_pad - N), (0, 0)))
        # padded nodes get an id that never lands in a real graph row
        batch2d = jnp.pad(batch2d, ((0, 0), (0, n_pad - N)),
                          constant_values=int(num_graphs))

    # ---- specs ----
    in_specs = [
        pl.BlockSpec((1, tile_n), lambda i: (0, i)),          # batch ids
        pl.BlockSpec((tile_n, F), lambda i: (i, 0)),          # node features
    ]
    in_specs += [pl.BlockSpec(w.shape, lambda i: (0, 0)) for w in flat_weights]

    out_shapes, out_specs = [], []
    if n_node:
        node_pad = meta["node_pad"]
        out_shapes.append(jax.ShapeDtypeStruct((n_pad, node_pad), jnp.float32))
        out_specs.append(pl.BlockSpec((tile_n, node_pad), lambda i: (i, 0)))
    if n_graph:
        graph_pad = meta["graph_pad"]
        out_shapes.append(jax.ShapeDtypeStruct((b_pad, graph_pad), jnp.float32))
        out_specs.append(pl.BlockSpec((b_pad, graph_pad), lambda i: (0, 0)))

    scratch_shapes = []
    if n_graph:
        scratch_shapes = [pltpu.VMEM((b_pad, F), jnp.float32),
                          pltpu.VMEM((b_pad, 1), jnp.float32)]

    # ---- explicit VMEM budget (double-buffered tiles + resident weights) ----
    def _pb(shape, dtype):
        rows = 1
        for s in shape[:-1]:
            rows *= int(s)
        return (_round_up(rows, 8) * _round_up(int(shape[-1]), 128)
                * np.dtype(dtype).itemsize)

    vmem = 2 * (_pb((1, tile_n), jnp.int32) + _pb((tile_n, F), compute_dtype))
    vmem += 2 * sum(_pb(w.shape, w.dtype) for w in flat_weights)
    if n_node:
        vmem += 2 * _pb((tile_n, meta["node_pad"]), jnp.float32)
    if n_graph:
        vmem += 2 * _pb((b_pad, meta["graph_pad"]), jnp.float32)
        vmem += _pb((b_pad, F), jnp.float32) + _pb((b_pad, 1), jnp.float32)
    vmem_limit = min(int(vmem) + (16 << 20), 64 << 20)        # headroom, v7x-safe cap

    # ---- cost estimate for XLA's scheduler ----
    flops, trans = 0, 0
    wi = 0
    if n_node:
        for _ in range(n_node):
            w1, w2 = flat_weights[wi], flat_weights[wi + 1]; wi += 2
            flops += 2 * n_pad * (int(w1.size) + int(w2.size))
            trans += n_pad * (w1.shape[1] + w2.shape[1])
        w3n = flat_weights[wi]; wi += 1
        flops += 2 * n_pad * int(w3n.size)
    if n_graph:
        flops += 2 * n_pad * b_pad * F                        # pooling one-hot matmul
        ws1, ws2 = flat_weights[wi], flat_weights[wi + 1]; wi += 2
        flops += 2 * b_pad * (int(ws1.size) + int(ws2.size))
        trans += b_pad * (ws1.shape[1] + ws2.shape[1])
        for _ in range(n_graph):
            wh1, wh2 = flat_weights[wi], flat_weights[wi + 1]; wi += 2
            flops += 2 * b_pad * (int(wh1.size) + int(wh2.size))
            trans += b_pad * (wh1.shape[1] + wh2.shape[1])
        w3g = flat_weights[wi]; wi += 1
        flops += 2 * b_pad * int(w3g.size)
    bytes_accessed = (int(x.size) * np.dtype(compute_dtype).itemsize
                      + int(batch2d.size) * 4
                      + sum(int(w.size) * np.dtype(w.dtype).itemsize
                            for w in flat_weights))
    if n_node:
        bytes_accessed += n_pad * meta["node_pad"] * 4
    if n_graph:
        bytes_accessed += b_pad * meta["graph_pad"] * 4
    cost = pl.CostEstimate(flops=int(flops), transcendentals=int(trans),
                           bytes_accessed=int(bytes_accessed))

    kernel = _make_fused_kernel(n_node, n_graph, b_pad, tile_n, compute_dtype)
    grid_spec = pltpu.PrefetchScalarGridSpec(
        num_scalar_prefetch=0,
        grid=(n_tiles,),
        in_specs=in_specs,
        out_specs=out_specs,
        scratch_shapes=scratch_shapes,
    )
    result = pl.pallas_call(
        kernel,
        out_shape=tuple(out_shapes),
        grid_spec=grid_spec,
        compiler_params=pltpu.CompilerParams(
            # pooling accumulates across node tiles and the graph heads finalize on
            # the last tile, so the node axis must stay sequential ("arbitrary").
            dimension_semantics=("arbitrary",),
            vmem_limit_bytes=vmem_limit,
        ),
        cost_estimate=cost,
    )(batch2d, x, *flat_weights)
    if not isinstance(result, (tuple, list)):
        result = (result,)

    # ---- slice the lane-dense slabs back into per-head outputs ----
    node_out = result[0] if n_node else None
    graph_out = result[-1] if n_graph else None
    outputs = []
    node_off = graph_off = 0
    for ihead, htype in enumerate(head_type):
        d = int(head_dims[ihead])
        if htype == "graph":
            outputs.append(graph_out[:num_graphs, graph_off:graph_off + d])
            graph_off += d
        else:
            outputs.append(node_out[:N, node_off:node_off + d])
            node_off += d
    return outputs


# ---------------------------- parameter creation --------------------------------

def _e3nn_linear_weight(key, fan_in, fan_out):
    # e3nn o3.Linear: w ~ N(0, 1), output scaled by 1/sqrt(fan_in) (path norm).
    w = jax.random.normal(key, (fan_in, fan_out), dtype=jnp.float32)
    return w / math.sqrt(fan_in)


def make_params(key, num_scalar, dim_sharedlayers, dim_headlayers_graph,
                dim_headlayers_node, head_dims, head_type):
    keys = iter(jax.random.split(key, 16))
    params = {"heads": []}
    params["graph_shared"] = (
        _e3nn_linear_weight(next(keys), num_scalar, dim_sharedlayers),
        _e3nn_linear_weight(next(keys), dim_sharedlayers, dim_sharedlayers),
    )
    for ihead, htype in enumerate(head_type):
        if htype == "graph":
            h1, h2 = dim_headlayers_graph
            params["heads"].append((
                _e3nn_linear_weight(next(keys), dim_sharedlayers, h1),
                _e3nn_linear_weight(next(keys), h1, h2),
                _e3nn_linear_weight(next(keys), h2, head_dims[ihead]),
            ))
        else:  # node head (MLPNode, 'mlp')
            h1, h2 = dim_headlayers_node
            params["heads"].append((
                _e3nn_linear_weight(next(keys), num_scalar, h1),
                _e3nn_linear_weight(next(keys), h1, h2),
                _e3nn_linear_weight(next(keys), h2, head_dims[ihead]),
            ))
    return params


# ---------------------------------- reference -----------------------------------

def _reference(node_features, batch_ids, num_graphs, params, num_scalar, head_type):
    x = node_features[:, :num_scalar]
    onehot = (jnp.arange(num_graphs)[:, None] == batch_ids[None, :]).astype(jnp.float32)
    counts = jnp.maximum(jnp.sum(onehot, axis=-1, keepdims=True), 1.0)
    g = (onehot @ x) / counts
    outs = []
    for ihead, htype in enumerate(head_type):
        if htype == "graph":
            ws1, ws2 = params["graph_shared"]
            wh1, wh2, wh3 = params["heads"][ihead]
            h = jax.nn.silu(g @ ws1)
            h = jax.nn.silu(h @ ws2)
            h = jax.nn.silu(h @ wh1)
            h = jax.nn.silu(h @ wh2)
            outs.append(h @ wh3)
        else:
            w1, w2, w3 = params["heads"][ihead]
            h = jax.nn.silu(x @ w1)
            h = jax.nn.silu(h @ w2)
            outs.append(h @ w3)
    return outs


# ------------------------------------ main ---------------------------------------

if __name__ == "__main__":
    # Module config:
    #   input_irreps = "8x0e + 8x1o"  -> feature dim = 8 + 24 = 32, num_scalar = 8
    #   config_heads: graph {dim_sharedlayers: 16, num_sharedlayers: 2,
    #                        num_headlayers: 2, dim_headlayers: [16, 16]}
    #                 node  {type: 'mlp', num_headlayers: 2, dim_headlayers: [16, 16]}
    #   head_type = ['graph', 'node'], head_dims = [3, 4], activation = SiLU
    num_graphs = 2
    num_nodes = 8
    N_total = num_graphs * num_nodes
    num_scalar = 8
    feat_dim = 32
    head_type = ["graph", "node"]
    head_dims = [3, 4]

    key = jax.random.PRNGKey(0)
    k_x, k_p = jax.random.split(key)
    node_features = jax.random.normal(k_x, (N_total, feat_dim), dtype=jnp.float32)
    batch_ids = jnp.repeat(jnp.arange(num_graphs, dtype=jnp.int32), num_nodes)

    params = make_params(k_p, num_scalar,
                         dim_sharedlayers=16,
                         dim_headlayers_graph=[16, 16],
                         dim_headlayers_node=[16, 16],
                         head_dims=head_dims,
                         head_type=head_type)

    # one-time weight preprocessing (pad scalar rows, concat + lane-pad final layers)
    # note: pass compute_dtype=jnp.bfloat16 here (and to the forward) to use bf16
    # MXU inputs on v6e/v7x; f32 is kept as the default for bit-tight validation.
    flat_weights, meta = prepare_fused_params(params, head_type, head_dims,
                                              num_scalar, feat_dim)

    outs = multihead_decoder_forward(node_features, batch_ids, num_graphs,
                                     flat_weights, meta, head_type, head_dims)
    outs = [jax.block_until_ready(o) for o in outs]

    refs = _reference(node_features, batch_ids, num_graphs, params,
                      num_scalar, head_type)
    for o, r, htype in zip(outs, refs, head_type):
        assert o.shape == r.shape, (o.shape, r.shape)
        # graph heads go through the approx-reciprocal(+Newton) mean -> slightly
        # looser tolerance than the pure-matmul node path.
        tol = 1e-3 if htype == "graph" else 1e-4
        assert jnp.allclose(o, r, atol=tol, rtol=tol), f"{htype} head mismatch"

    print("KERNEL_OK")
</pallas_src>

<mosaic_0001>
module attributes {stable_mosaic.version = 11 : i64} {
  func.func @kernel(%arg0: i32, %arg1: memref<1x16xi32, #tpu.memory_space<vmem>>, %arg2: memref<16x32xf32, #tpu.memory_space<vmem>>, %arg3: memref<32x16xf32, #tpu.memory_space<vmem>>, %arg4: memref<16x16xf32, #tpu.memory_space<vmem>>, %arg5: memref<16x128xf32, #tpu.memory_space<vmem>>, %arg6: memref<32x16xf32, #tpu.memory_space<vmem>>, %arg7: memref<16x16xf32, #tpu.memory_space<vmem>>, %arg8: memref<16x16xf32, #tpu.memory_space<vmem>>, %arg9: memref<16x16xf32, #tpu.memory_space<vmem>>, %arg10: memref<16x128xf32, #tpu.memory_space<vmem>>, %arg11: memref<16x128xf32, #tpu.memory_space<vmem>>, %arg12: memref<8x128xf32, #tpu.memory_space<vmem>>, %arg13: memref<8x32xf32, #tpu.memory_space<vmem>>, %arg14: memref<8x1xf32, #tpu.memory_space<vmem>>) attributes {dimension_semantics = [#tpu.dimension_semantics<arbitrary>], iteration_bounds = array<i64: 1>, scalar_prefetch = 0 : i64, scratch_operands = 2 : i64, tpu.core_type = #tpu.core_type<tc>, window_params = [{transform_indices = @transform_0, window_bounds = array<i64: 1, 16>}, {transform_indices = @transform_1, window_bounds = array<i64: 16, 32>}, {pipeline_mode = #tpu.pipeline_mode<synchronous>, transform_indices = @transform_2, window_bounds = array<i64: 32, 16>}, {pipeline_mode = #tpu.pipeline_mode<synchronous>, transform_indices = @transform_3, window_bounds = array<i64: 16, 16>}, {pipeline_mode = #tpu.pipeline_mode<synchronous>, transform_indices = @transform_4, window_bounds = array<i64: 16, 128>}, {pipeline_mode = #tpu.pipeline_mode<synchronous>, transform_indices = @transform_5, window_bounds = array<i64: 32, 16>}, {pipeline_mode = #tpu.pipeline_mode<synchronous>, transform_indices = @transform_6, window_bounds = array<i64: 16, 16>}, {pipeline_mode = #tpu.pipeline_mode<synchronous>, transform_indices = @transform_7, window_bounds = array<i64: 16, 16>}, {pipeline_mode = #tpu.pipeline_mode<synchronous>, transform_indices = @transform_8, window_bounds = array<i64: 16, 16>}, {pipeline_mode = #tpu.pipeline_mode<synchronous>, transform_indices = @transform_9, window_bounds = array<i64: 16, 128>}, {transform_indices = @transform_10, window_bounds = array<i64: 16, 128>}, {pipeline_mode = #tpu.pipeline_mode<synchronous>, transform_indices = @transform_11, window_bounds = array<i64: 8, 128>}]} {
    %c0 = arith.constant 0 : index
    %c0_0 = arith.constant 0 : index
    %0 = vector.load %arg2[%c0, %c0_0] : memref<16x32xf32, #tpu.memory_space<vmem>>, vector<16x32xf32>
    %c0_i32 = arith.constant 0 : i32
    %1 = arith.cmpi eq, %arg0, %c0_i32 : i32
    %2 = arith.extui %1 : i1 to i32
    %c0_i32_1 = arith.constant 0 : i32
    %3 = arith.cmpi ne, %2, %c0_i32_1 : i32
    scf.if %3 {
      %cst_28 = arith.constant 0.000000e+00 : f32
      %41 = vector.broadcast %cst_28 : f32 to vector<8x32xf32>
      %c0_29 = arith.constant 0 : index
      %c0_30 = arith.constant 0 : index
      %42 = vector.load %arg13[%c0_29, %c0_30] : memref<8x32xf32, #tpu.memory_space<vmem>>, vector<8x32xf32>
      tpu.vector_store %arg13[%c0_29, %c0_30], %41 {strides = array<i32>} : memref<8x32xf32, #tpu.memory_space<vmem>>, vector<8x32xf32>,
      %cst_31 = arith.constant 0.000000e+00 : f32
      %43 = vector.broadcast %cst_31 : f32 to vector<8x1xf32>
      %c0_32 = arith.constant 0 : index
      %c0_33 = arith.constant 0 : index
      %44 = vector.load %arg14[%c0_32, %c0_33] : memref<8x1xf32, #tpu.memory_space<vmem>>, vector<8x1xf32>
      tpu.vector_store %arg14[%c0_32, %c0_33], %43 {strides = array<i32>} : memref<8x1xf32, #tpu.memory_space<vmem>>, vector<8x1xf32>,
    } else {
    }
    %4 = tpu.iota {dimensions = array<i32: 0>} : vector<8x16xi32>
    %c0_2 = arith.constant 0 : index
    %c0_3 = arith.constant 0 : index
    %5 = vector.load %arg1[%c0_2, %c0_3] : memref<1x16xi32, #tpu.memory_space<vmem>>, vector<1x16xi32>
    %6 = vector.broadcast %5 : vector<1x16xi32> to vector<8x16xi32>
    %7 = arith.cmpi eq, %4, %6 : vector<8x16xi32>
    %8 = arith.extui %7 : vector<8x16xi1> to vector<8x16xi32>
    %9 = arith.sitofp %8 : vector<8x16xi32> to vector<8x16xf32>
    %c0_4 = arith.constant 0 : index
    %c0_5 = arith.constant 0 : index
    %10 = vector.load %arg13[%c0_4, %c0_5] : memref<8x32xf32, #tpu.memory_space<vmem>>, vector<8x32xf32>
    %cst = arith.constant dense<0.000000e+00> : vector<8x32xf32>
    %11 = tpu.matmul %9, %0, %cst {dimension_numbers = #tpu.dot_dimension_numbers<[1], [0], [0], [1], [0, 0, 1, 1], [], []>} : vector<8x16xf32>, vector<16x32xf32>, vector<8x32xf32> -> vector<8x32xf32>
    %12 = arith.addf %10, %11 : vector<8x32xf32>
    %c0_6 = arith.constant 0 : index
    %c0_7 = arith.constant 0 : index
    %13 = vector.load %arg13[%c0_6, %c0_7] : memref<8x32xf32, #tpu.memory_space<vmem>>, vector<8x32xf32>
    tpu.vector_store %arg13[%c0_6, %c0_7], %12 {strides = array<i32>} : memref<8x32xf32, #tpu.memory_space<vmem>>, vector<8x32xf32>,
    %c0_8 = arith.constant 0 : index
    %c0_9 = arith.constant 0 : index
    %14 = vector.load %arg14[%c0_8, %c0_9] : memref<8x1xf32, #tpu.memory_space<vmem>>, vector<8x1xf32>
    %cst_10 = arith.constant dense<0.000000e+00> : vector<8xf32>
    %15 = vector.multi_reduction <add>, %9, %cst_10 [1] : vector<8x16xf32> to vector<8xf32>
    %16 = vector.shape_cast %15 : vector<8xf32> to vector<8x1xf32>
    %17 = arith.addf %14, %16 : vector<8x1xf32>
    %c0_11 = arith.constant 0 : index
    %c0_12 = arith.constant 0 : index
    %18 = vector.load %arg14[%c0_11, %c0_12] : memref<8x1xf32, #tpu.memory_space<vmem>>, vector<8x1xf32>
    tpu.vector_store %arg14[%c0_11, %c0_12], %17 {strides = array<i32>} : memref<8x1xf32, #tpu.memory_space<vmem>>, vector<8x1xf32>,
    %c0_13 = arith.constant 0 : index
    %c0_14 = arith.constant 0 : index
    %19 = vector.load %arg3[%c0_13, %c0_14] : memref<32x16xf32, #tpu.memory_space<vmem>>, vector<32x16xf32>
    %cst_15 = arith.constant dense<0.000000e+00> : vector<16x16xf32>
    %20 = tpu.matmul %0, %19, %cst_15 {dimension_numbers = #tpu.dot_dimension_numbers<[1], [0], [0], [1], [0, 0, 1, 1], [], []>} : vector<16x32xf32>, vector<32x16xf32>, vector<16x16xf32> -> vector<16x16xf32>
    %21 = arith.negf %20 : vector<16x16xf32>
    %22 = math.exp %21 : vector<16x16xf32>
    %cst_16 = arith.constant 1.000000e+00 : f32
    %23 = vector.broadcast %cst_16 : f32 to vector<16x16xf32>
    %24 = arith.addf %23, %22 : vector<16x16xf32>
    %25 = arith.divf %23, %24 : vector<16x16xf32>
    %26 = arith.mulf %20, %25 : vector<16x16xf32>
    %c0_17 = arith.constant 0 : index
    %c0_18 = arith.constant 0 : index
    %27 = vector.load %arg4[%c0_17, %c0_18] : memref<16x16xf32, #tpu.memory_space<vmem>>, vector<16x16xf32>
    %cst_19 = arith.constant dense<0.000000e+00> : vector<16x16xf32>
    %28 = tpu.matmul %26, %27, %cst_19 {dimension_numbers = #tpu.dot_dimension_numbers<[1], [0], [0], [1], [0, 0, 1, 1], [], []>} : vector<16x16xf32>, vector<16x16xf32>, vector<16x16xf32> -> vector<16x16xf32>
    %29 = arith.negf %28 : vector<16x16xf32>
    %30 = math.exp %29 : vector<16x16xf32>
    %cst_20 = arith.constant 1.000000e+00 : f32
    %31 = vector.broadcast %cst_20 : f32 to vector<16x16xf32>
    %32 = arith.addf %31, %30 : vector<16x16xf32>
    %33 = arith.divf %31, %32 : vector<16x16xf32>
    %34 = arith.mulf %28, %33 : vector<16x16xf32>
    %c0_21 = arith.constant 0 : index
    %c0_22 = arith.constant 0 : index
    %35 = vector.load %arg5[%c0_21, %c0_22] : memref<16x128xf32, #tpu.memory_space<vmem>>, vector<16x128xf32>
    %cst_23 = arith.constant dense<0.000000e+00> : vector<16x128xf32>
    %36 = tpu.matmul %34, %35, %cst_23 {dimension_numbers = #tpu.dot_dimension_numbers<[1], [0], [0], [1], [0, 0, 1, 1], [], []>} : vector<16x16xf32>, vector<16x128xf32>, vector<16x128xf32> -> vector<16x128xf32>
    %c0_24 = arith.constant 0 : index
    %c0_25 = arith.constant 0 : index
    %37 = vector.load %arg11[%c0_24, %c0_25] : memref<16x128xf32, #tpu.memory_space<vmem>>, vector<16x128xf32>
    tpu.vector_store %arg11[%c0_24, %c0_25], %36 {strides = array<i32>} : memref<16x128xf32, #tpu.memory_space<vmem>>, vector<16x128xf32>,
    %c0_i32_26 = arith.constant 0 : i32
    %38 = arith.cmpi eq, %arg0, %c0_i32_26 : i32
    %39 = arith.extui %38 : i1 to i32
    %c0_i32_27 = arith.constant 0 : i32
    %40 = arith.cmpi ne, %39, %c0_i32_27 : i32
    scf.if %40 {
      %c0_28 = arith.constant 0 : index
      %c0_29 = arith.constant 0 : index
      %41 = vector.load %arg14[%c0_28, %c0_29] : memref<8x1xf32, #tpu.memory_space<vmem>>, vector<8x1xf32>
      %cst_30 = arith.constant 1.000000e+00 : f32
      %42 = vector.broadcast %cst_30 : f32 to vector<8x1xf32>
      %43 = arith.maximumf %41, %42 : vector<8x1xf32>
      %44 = tpu.reciprocal %43 {approx = true} : vector<8x1xf32> -> vector<8x1xf32>
      %45 = arith.mulf %43, %44 : vector<8x1xf32>
      %cst_31 = arith.constant 2.000000e+00 : f32
      %46 = vector.broadcast %cst_31 : f32 to vector<8x1xf32>
      %47 = arith.subf %46, %45 : vector<8x1xf32>
      %48 = arith.mulf %44, %47 : vector<8x1xf32>
      %c0_32 = arith.constant 0 : index
      %c0_33 = arith.constant 0 : index
      %49 = vector.load %arg13[%c0_32, %c0_33] : memref<8x32xf32, #tpu.memory_space<vmem>>, vector<8x32xf32>
      %50 = vector.broadcast %48 : vector<8x1xf32> to vector<8x32xf32>
      %51 = arith.mulf %49, %50 : vector<8x32xf32>
      %c0_34 = arith.constant 0 : index
      %c0_35 = arith.constant 0 : index
      %52 = vector.load %arg6[%c0_34, %c0_35] : memref<32x16xf32, #tpu.memory_space<vmem>>, vector<32x16xf32>
      %cst_36 = arith.constant dense<0.000000e+00> : vector<8x16xf32>
      %53 = tpu.matmul %51, %52, %cst_36 {dimension_numbers = #tpu.dot_dimension_numbers<[1], [0], [0], [1], [0, 0, 1, 1], [], []>} : vector<8x32xf32>, vector<32x16xf32>, vector<8x16xf32> -> vector<8x16xf32>
      %54 = arith.negf %53 : vector<8x16xf32>
      %55 = math.exp %54 : vector<8x16xf32>
      %cst_37 = arith.constant 1.000000e+00 : f32
      %56 = vector.broadcast %cst_37 : f32 to vector<8x16xf32>
      %57 = arith.addf %56, %55 : vector<8x16xf32>
      %58 = arith.divf %56, %57 : vector<8x16xf32>
      %59 = arith.mulf %53, %58 : vector<8x16xf32>
      %c0_38 = arith.constant 0 : index
      %c0_39 = arith.constant 0 : index
      %60 = vector.load %arg7[%c0_38, %c0_39] : memref<16x16xf32, #tpu.memory_space<vmem>>, vector<16x16xf32>
      %cst_40 = arith.constant dense<0.000000e+00> : vector<8x16xf32>
      %61 = tpu.matmul %59, %60, %cst_40 {dimension_numbers = #tpu.dot_dimension_numbers<[1], [0], [0], [1], [0, 0, 1, 1], [], []>} : vector<8x16xf32>, vector<16x16xf32>, vector<8x16xf32> -> vector<8x16xf32>
      %62 = arith.negf %61 : vector<8x16xf32>
      %63 = math.exp %62 : vector<8x16xf32>
      %cst_41 = arith.constant 1.000000e+00 : f32
      %64 = vector.broadcast %cst_41 : f32 to vector<8x16xf32>
      %65 = arith.addf %64, %63 : vector<8x16xf32>
      %66 = arith.divf %64, %65 : vector<8x16xf32>
      %67 = arith.mulf %61, %66 : vector<8x16xf32>
      %c0_42 = arith.constant 0 : index
      %c0_43 = arith.constant 0 : index
      %68 = vector.load %arg8[%c0_42, %c0_43] : memref<16x16xf32, #tpu.memory_space<vmem>>, vector<16x16xf32>
      %cst_44 = arith.constant dense<0.000000e+00> : vector<8x16xf32>
      %69 = tpu.matmul %67, %68, %cst_44 {dimension_numbers = #tpu.dot_dimension_numbers<[1], [0], [0], [1], [0, 0, 1, 1], [], []>} : vector<8x16xf32>, vector<16x16xf32>, vector<8x16xf32> -> vector<8x16xf32>
      %70 = arith.negf %69 : vector<8x16xf32>
      %71 = math.exp %70 : vector<8x16xf32>
      %cst_45 = arith.constant 1.000000e+00 : f32
      %72 = vector.broadcast %cst_45 : f32 to vector<8x16xf32>
      %73 = arith.addf %72, %71 : vector<8x16xf32>
      %74 = arith.divf %72, %73 : vector<8x16xf32>
      %75 = arith.mulf %69, %74 : vector<8x16xf32>
      %c0_46 = arith.constant 0 : index
      %c0_47 = arith.constant 0 : index
      %76 = vector.load %arg9[%c0_46, %c0_47] : memref<16x16xf32, #tpu.memory_space<vmem>>, vector<16x16xf32>
      %cst_48 = arith.constant dense<0.000000e+00> : vector<8x16xf32>
      %77 = tpu.matmul %75, %76, %cst_48 {dimension_numbers = #tpu.dot_dimension_numbers<[1], [0], [0], [1], [0, 0, 1, 1], [], []>} : vector<8x16xf32>, vector<16x16xf32>, vector<8x16xf32> -> vector<8x16xf32>
      %78 = arith.negf %77 : vector<8x16xf32>
      %79 = math.exp %78 : vector<8x16xf32>
      %cst_49 = arith.constant 1.000000e+00 : f32
      %80 = vector.broadcast %cst_49 : f32 to vector<8x16xf32>
      %81 = arith.addf %80, %79 : vector<8x16xf32>
      %82 = arith.divf %80, %81 : vector<8x16xf32>
      %83 = arith.mulf %77, %82 : vector<8x16xf32>
      %c0_50 = arith.constant 0 : index
      %c0_51 = arith.constant 0 : index
      %84 = vector.load %arg10[%c0_50, %c0_51] : memref<16x128xf32, #tpu.memory_space<vmem>>, vector<16x128xf32>
      %cst_52 = arith.constant dense<0.000000e+00> : vector<8x128xf32>
      %85 = tpu.matmul %83, %84, %cst_52 {dimension_numbers = #tpu.dot_dimension_numbers<[1], [0], [0], [1], [0, 0, 1, 1], [], []>} : vector<8x16xf32>, vector<16x128xf32>, vector<8x128xf32> -> vector<8x128xf32>
      %c0_53 = arith.constant 0 : index
      %c0_54 = arith.constant 0 : index
      %86 = vector.load %arg12[%c0_53, %c0_54] : memref<8x128xf32, #tpu.memory_space<vmem>>, vector<8x128xf32>
      tpu.vector_store %arg12[%c0_53, %c0_54], %85 {strides = array<i32>} : memref<8x128xf32, #tpu.memory_space<vmem>>, vector<8x128xf32>,
    } else {
    }
    return
  }
  func.func @transform_0(%arg0: i32) -> (i32, i32) {
    %c0_i32 = arith.constant 0 : i32
    %c0_i32_0 = arith.constant 0 : i32
    return %c0_i32, %arg0 : i32, i32
  }
  func.func @transform_1(%arg0: i32) -> (i32, i32) {
    %c0_i32 = arith.constant 0 : i32
    %c0_i32_0 = arith.constant 0 : i32
    return %arg0, %c0_i32 : i32, i32
  }
  func.func @transform_2(%arg0: i32) -> (i32, i32) {
    %c0_i32 = arith.constant 0 : i32
    %c0_i32_0 = arith.constant 0 : i32
    %c0_i32_1 = arith.constant 0 : i32
    return %c0_i32, %c0_i32_0 : i32, i32
  }
  func.func @transform_3(%arg0: i32) -> (i32, i32) {
    %c0_i32 = arith.constant 0 : i32
    %c0_i32_0 = arith.constant 0 : i32
    %c0_i32_1 = arith.constant 0 : i32
    return %c0_i32, %c0_i32_0 : i32, i32
  }
  func.func @transform_4(%arg0: i32) -> (i32, i32) {
    %c0_i32 = arith.constant 0 : i32
    %c0_i32_0 = arith.constant 0 : i32
    %c0_i32_1 = arith.constant 0 : i32
    return %c0_i32, %c0_i32_0 : i32, i32
  }
  func.func @transform_5(%arg0: i32) -> (i32, i32) {
    %c0_i32 = arith.constant 0 : i32
    %c0_i32_0 = arith.constant 0 : i32
    %c0_i32_1 = arith.constant 0 : i32
    return %c0_i32, %c0_i32_0 : i32, i32
  }
  func.func @transform_6(%arg0: i32) -> (i32, i32) {
    %c0_i32 = arith.constant 0 : i32
    %c0_i32_0 = arith.constant 0 : i32
    %c0_i32_1 = arith.constant 0 : i32
    return %c0_i32, %c0_i32_0 : i32, i32
  }
  func.func @transform_7(%arg0: i32) -> (i32, i32) {
    %c0_i32 = arith.constant 0 : i32
    %c0_i32_0 = arith.constant 0 : i32
    %c0_i32_1 = arith.constant 0 : i32
    return %c0_i32, %c0_i32_0 : i32, i32
  }
  func.func @transform_8(%arg0: i32) -> (i32, i32) {
    %c0_i32 = arith.constant 0 : i32
    %c0_i32_0 = arith.constant 0 : i32
    %c0_i32_1 = arith.constant 0 : i32
    return %c0_i32, %c0_i32_0 : i32, i32
  }
  func.func @transform_9(%arg0: i32) -> (i32, i32) {
    %c0_i32 = arith.constant 0 : i32
    %c0_i32_0 = arith.constant 0 : i32
    %c0_i32_1 = arith.constant 0 : i32
    return %c0_i32, %c0_i32_0 : i32, i32
  }
  func.func @transform_10(%arg0: i32) -> (i32, i32) {
    %c0_i32 = arith.constant 0 : i32
    %c0_i32_0 = arith.constant 0 : i32
    return %arg0, %c0_i32 : i32, i32
  }
  func.func @transform_11(%arg0: i32) -> (i32, i32) {
    %c0_i32 = arith.constant 0 : i32
    %c0_i32_0 = arith.constant 0 : i32
    %c0_i32_1 = arith.constant 0 : i32
    return %c0_i32, %c0_i32_0 : i32, i32
  }
}

</mosaic_0001>

<bundles_post_ra>
// kernel: tpu_custom_call.1
= control target key start
LH: loop header
LB: loop body
LE: loop exit
PB: predicated region body
PF: predicated region fallthrough
CT: control target
= control target key end

     0   :  { %17 = vsyncpa [#allocation5], 0  ;;  %s1380_s0 = inlined_call_operand.hbm [shape: s32[1,16], index: 0, kind: input, shape index: {}]   ;;  %s1381_s1 = inlined_call_operand.vmem [shape: f32[16,32], index: 1, kind: input, shape index: {}]   ;;  %s1382_s2 = inlined_call_operand.vmem [shape: f32[32,16], index: 2, kind: input, shape index: {}]   ;;  %s1383_s3 = inlined_call_operand.vmem [shape: f32[16,16], index: 3, kind: input, shape index: {}]   ;;  %s1384_s4 = inlined_call_operand.vmem [shape: f32[16,128], index: 4, kind: input, shape index: {}]   ;;  %s1385_s5 = inlined_call_operand.vmem [shape: f32[32,16], index: 5, kind: input, shape index: {}]   ;;  %s1386_s6 = inlined_call_operand.vmem [shape: f32[16,16], index: 6, kind: input, shape index: {}]   ;;  %s1387_s7 = inlined_call_operand.vmem [shape: f32[16,16], index: 7, kind: input, shape index: {}]   ;;  %s1388_s8 = inlined_call_operand.vmem [shape: f32[16,16], index: 8, kind: input, shape index: {}]   ;;  %s1389_s9 = inlined_call_operand.vmem [shape: f32[16,128], index: 9, kind: input, shape index: {}]   ;;  %s1390_s10 = inlined_call_operand.hbm [shape: f32[16,128], index: 10, kind: output, shape index: {0}]   ;;  %s1391_s11 = inlined_call_operand.hbm [shape: f32[8,128], index: 11, kind: output, shape index: {1}]  }
   0x1   :  { %18 = vsyncpa [#allocation6], 0 }
   0x2   :  { %19 = vsyncpa [#allocation9], 0  ;;  %s1170_s17 = smov [#allocation4]   ;;  %s1098_s21 = scalar_lea.hbm %s1380_s0, 16 }
   0x3   :  { %s26_s18 = sshll.u32 %s1170_s17, 4  ;;  %p1099_p0 = scmp.ne.s32.totalorder %s1380_s0, %s1098_s21  ;;  %s27_s18 = int_to_ptr.vmem [resolvable:$true] %s26_s18 }
   0x4   :  { %p1102_p1 = scmp.lt.u32.totalorder %s1098_s21, %s1380_s0 }
   0x6   :  { %p1104_p2 = pnand %p1102_p1, %p1099_p0 }
   0x8   :  { %1107 = shalt.err (!%p1104_p2)
}
   0x9   :  { %s1108_s26 = scalar_lea.vmem %s27_s18, 16  ;;  %s1112_s27 = scalar_lea.vmem %s27_s18, 32 }
   0xa   :  { %p1109_p3 = scmp.ne.s32.totalorder %s27_s18, %s1108_s26  ;;  %p1113_p4 = scmp.lt.s32.totalorder %s27_s18, %s27_s18 }
   0xb   :  { %p1114_p5 = scmp.lt.s32.totalorder %s1112_s27, %s1108_s26 }
   0xd   :  { %p1115_p6 = por %p1114_p5, %p1113_p4 }
   0xf   :  { %p1116_p7 = pnand %p1115_p6, %p1109_p3 }
  0x11   :  { %1119 = shalt.err (!%p1116_p7)
}
  0x12   :  { %29 = dma.hbm_to_vmem [thread:$0]  %s1380_s0, 16, %s27_s18, [#allocation5]  }
  0x13   :  { %1164 = dma.done.wait [#allocation5], 16  }
  0x14   :  { %1165 = vsyncadd [#allocation5], 4294967280  ;;  %v61_v0 = vlaneseq  ;;  %vm57_vm0 = vcmask 261120   ;;  %v1171_v1 = vmov 0.0   ;;  %vm59_vm1 = vcmask 7168   ;;  %v156_v4 = vld [vmem:[%s1382_s2] sm:$0xff] }
  0x15   :  { %58 = vst.msk [vmem:[#allocation2] sm:$0xff] %vm57_vm0, %v1171_v1  ;;  %v1172_v2 = vmov 0.0|0.0   ;;  %vm1173_vm2 = vmmov 0   ;;  %v157_v5 = vld [vmem:[%s1382_s2 + $0x8] sm:$0xff]  ;;  %v890_v6 = vld [vmem:[#allocation4] ss:$0 sm:$0xff] }
  0x16   :  { %1017 = vmatprep.subr.bf16.mxu0 %v1172_v2  ;;  %950 = vmatprep.mubr.msk.f32.mxu0 %vm1173_vm2, %v1171_v1  ;;  %60 = vst.msk [vmem:[#allocation3] sm:$0xff] %vm59_vm1, %v1171_v1  ;;  %v62_v3 = vshrl.u32 %v61_v0, 7  ;;  %vm72_vm3 = vcmask 130048   ;;  %v1020_v7 = vpack.c.bf16 %v157_v5, %v156_v4  ;;  %v158_v8 = vld [vmem:[%s1382_s2 + $0x10] sm:$0xff]  ;;  %v159_v9 = vld [vmem:[%s1382_s2 + $0x18] sm:$0xff]  ;;  %v51_v10 = vld [vmem:[%s1381_s1] sm:$0xff] }
  0x17   :  { %v1024_v12 = vpack.c.bf16 %v159_v9, %v158_v8  ;;  %961 = vmatprep.mubr.msk.f32.mxu1 %vm57_vm0, %v51_v10  ;;  %v52_v13 = vld [vmem:[%s1381_s1 + $0x8] sm:$0xff]  ;;  %v1174_v16 = vmov 0   ;;  %v255_v17 = vld [vmem:[%s1383_s3] sm:$0xff]  ;;  %v455_v31 = vld [vmem:[%s1385_s5 + $0x10] sm:$0xff] }
  0x18   :  { %vm68_vm4 = vcmp.eq.s32.totalorder %v62_v3, %v890_v6  ;;  %1021 = vmatprep.subr.bf16.mxu1 %v1020_v7  ;;  %v1018_v15 = vpack.c.bf16 %v52_v13, %v51_v10  ;;  %1063 = vset.pattern.permute.xlu0 %v1174_v16  ;;  %v256_v18 = vld [vmem:[%s1383_s3 + $0x8] sm:$0xff]  ;;  %v453_v20 = vld [vmem:[%s1385_s5] sm:$0xff]  ;;  %v456_v32 = vld [vmem:[%s1385_s5 + $0x18] sm:$0xff] }
  0x19   :  { %v891_v11 = vsel %vm68_vm4, 1.0, %v1171_v1  ;;  %1023 = vmatpush3.bf16.msra.mxu1 %v1020_v7  ;;  %v1028_v19 = vpack.c.bf16 %v256_v18, %v255_v17  ;;  %v454_v21 = vld [vmem:[%s1385_s5 + $0x8] sm:$0xff]  ;;  %v1040_v33 = vpack.c.bf16 %v456_v32, %v455_v31  ;;  %v352_v54 = vld [vmem:[%s1384_s4] sm:$0xff] }
  0x1a   :  { %v150_v14 = vsel %vm72_vm3, %v891_v11, 0.0  ;;  %1025 = vmatprep.subr.bf16.mxu1 %v1024_v12  ;;  %1019 = vmatpush3.bf16.msra.mxu0 %v1018_v15  ;;  %v1037_v22 = vpack.c.bf16 %v454_v21, %v453_v20  ;;  %v353_v55 = vld [vmem:[%s1384_s4 + $0x8] sm:$0xff]  ;;  %v537_v3 = vld [vmem:[%s1386_s6] sm:$0xff] }
  0x1b   :  { %151 = vadd.xlane.f32.xlu0 %v150_v14  ;;  %1029 = vmatprep.subr.bf16.mxu0 %v1028_v19  ;;  %v1032_v56 = vpack.c.bf16 %v353_v55, %v352_v54  ;;  %v538_v4 = vld [vmem:[%s1386_s6 + $0x8] sm:$0xff]  ;;  %v619_v17 = vld [vmem:[%s1387_s7] sm:$0xff] }
  0x1c   :  { %v71_v35 = vld [vmem:[#allocation2] sm:$0xff]  ;;  %v1043_v8 = vpack.c.bf16 %v538_v4, %v537_v3  ;;  %v620_v18 = vld [vmem:[%s1387_s7 + $0x8] sm:$0xff] }
  0x1d   :  { %1027 = vmatpush3.bf16.msra.mxu1 %v1024_v12  ;;  %951 = vmatmul.mubr.msk.f32.vlgmr.msra.gmra.mrb[0].mxu0 %vm72_vm3, %v891_v11  ;;  %v149_v23 = vld [vmem:[#allocation3] sm:$0xff] }
  0x1e   :  { %1036 = vmatprep.subr.bf16.mxu1 %v1172_v2  ;;  %1031 = vmatpush3.bf16.msra.mxu0 %v1028_v19  ;;  %v1046_v19 = vpack.c.bf16 %v620_v18, %v619_v17 }
  0x1f   :  { %1033 = vmatprep.subr.bf16.mxu0 %v1032_v56 }
  0x20   :  { %962 = vmatmul.mubr.msk.f32.vlgmr.msra.gmra.mrb[0].mxu1 %vm57_vm0, %v52_v13 }
  0x21   :  { %986 = vmatprep.mubr.msk.f32.mxu1 %vm1173_vm2, %v1171_v1  ;;  %1038 = vmatpush3.bf16.msra.mxu1 %v1037_v22 }
  0x22   :  { %1039 = vmatprep.subr.bf16.mxu1 %v1172_v2 }
  0x25   :  { %1041 = vmatpush3.bf16.msra.mxu1 %v1040_v33 }
  0x26   :  { %1048 = vmatprep.subr.bf16.mxu1 %v1172_v2 }
  0xa8   :  { %v152_v24 = vpop.xlane.xlu0 %151 }
  0xa9   :  { %v153_v25 = vadd.f32 %v152_v24, %v149_v23 }
  0xab   :  { %155 = vst.msk [vmem:[#allocation3] sm:$0xff] %vm59_vm1, %v153_v25 }
  0xb2   :  { %v440_v26 = vld [vmem:[#allocation3] sm:$0xff] }
  0xb3   :  { %v441_v27 = vmax.f32 %v440_v26, 1.0 }
  0xb5   :  { %1064 = vrcp.f32 %v441_v27 }
  0xbf   :  { %v1065_v28 = vpop.eup %1064 }
  0xc0   :  { %v443_v29 = vmul.f32 %v1065_v28, %v441_v27 }
  0xc2   :  { %v444_v30 = vsub.f32 2.0, %v443_v29  ;;  %v702_v29 = vld [vmem:[%s1388_s8 + $0x8] sm:$0xff] }
  0xc4   :  { %v445_v34 = vmul.f32 %v1065_v28, %v444_v30 }
  0xc6   :  { %449 = vperm.xlu0 %1063, %v445_v34  }
  0xf0   :  { %v142_v36 = vpop.f32.mrb[0].mxu0 }
  0xf1   :  { %v146_v37 = vadd.f32 %v142_v36, %v71_v35  ;;  %v952_v38 = vpop.f32.mrb[1].mxu0 }
  0xf2   :  { %v784_v38 = vld [vmem:[%s1389_s9 + $0x8] sm:$0xff] }
  0xf3   :  { %v963_v39 = vpop.f32.mrb[0].mxu1  ;;  %148 = vst.msk [vmem:[#allocation2] sm:$0xff] %vm57_vm0, %v146_v37 }
  0xf4   :  { %v896_v40 = vmul.f32 -1.442695, %v963_v39  ;;  %v232_v41 = vpop.f32.mrb[1].mxu1 }
  0xf5   :  { %v895_v42 = vmul.f32 -1.442695, %v232_v41 }
  0xf6   :  { %1066 = vpow2.f32 %v896_v40 }
  0xf7   :  { %1068 = vpow2.f32 %v895_v42 }
  0xfa   :  { %v446_v51 = vld [vmem:[#allocation2] sm:$0xff] }
 0x100   :  { %v1067_v43 = vpop.eup %1066 }
 0x101   :  { %v1069_v44 = vpop.eup %1068  ;;  %v248_v45 = vadd.f32 1.0, %v1067_v43 }
 0x102   :  { %v247_v46 = vadd.f32 1.0, %v1069_v44 }
 0x103   :  { %1070 = vrcp.f32 %v248_v45 }
 0x104   :  { %1072 = vrcp.f32 %v247_v46 }
 0x10d   :  { %v1071_v47 = vpop.eup %1070 }
 0x10e   :  { %v1073_v48 = vpop.eup %1072  ;;  %v254_v49 = vmul.f32 %v1071_v47, %v963_v39 }
 0x10f   :  { %v253_v50 = vmul.f32 %v1073_v48, %v232_v41 }
 0x111   :  { %968 = vmatprep.mubr.msk.f32.mxu0 %vm72_vm3, %v253_v50 }
 0x112   :  { %969 = vmatmul.mubr.msk.f32.vlgmr.msra.gmra.mrb[2].mxu0 %vm72_vm3, %v254_v49 }
 0x113   :  { %1035 = vmatpush3.bf16.msra.mxu0 %v1032_v56 }
 0x114   :  { %1042 = vmatprep.subr.bf16.mxu0 %v1172_v2 }
 0x145   :  { %v450_v52 = vpop.permute.xlu0 %449 }
 0x146   :  { %v452_v53 = vmul.f32 %v450_v52, %v446_v51 }
 0x148   :  { %987 = vmatmul.mubr.msk.f32.vlgmr.msra.gmra.mrb[2].mxu1 %vm57_vm0, %v452_v53 }
 0x149   :  { %1007 = vmatprep.mubr.msk.f32.mxu1 %vm1173_vm2, %v1171_v1 }
 0x1e5   :  { %v970_v57 = vpop.f32.mrb[2].mxu0 }
 0x1e6   :  { %v900_v58 = vmul.f32 -1.442695, %v970_v57  ;;  %v329_v59 = vpop.f32.mrb[3].mxu0 }
 0x1e7   :  { %v899_v60 = vmul.f32 -1.442695, %v329_v59 }
 0x1e8   :  { %1074 = vpow2.f32 %v900_v58 }
 0x1e9   :  { %1076 = vpow2.f32 %v899_v60 }
 0x1f2   :  { %v1075_v61 = vpop.eup %1074 }
 0x1f3   :  { %v1077_v62 = vpop.eup %1076  ;;  %v345_v63 = vadd.f32 1.0, %v1075_v61 }
 0x1f4   :  { %v344_v0 = vadd.f32 1.0, %v1077_v62 }
 0x1f5   :  { %1078 = vrcp.f32 %v345_v63 }
 0x1f6   :  { %1080 = vrcp.f32 %v344_v0 }
 0x1ff   :  { %v1079_v5 = vpop.eup %1078 }
 0x200   :  { %v1081_v6 = vpop.eup %1080  ;;  %v351_v9 = vmul.f32 %v1079_v5, %v970_v57 }
 0x201   :  { %v350_v7 = vmul.f32 %v1081_v6, %v329_v59 }
 0x203   :  { %975 = vmatprep.mubr.msk.f32.mxu0 %vm72_vm3, %v350_v7 }
 0x204   :  { %976 = vmatmul.mubr.msk.f32.vlgmr.msra.gmra.mrb[4].mxu0 %vm72_vm3, %v351_v9 }
 0x205   :  { %1044 = vmatpush3.bf16.msra.mxu0 %v1043_v8  ;;  %993 = vmatprep.mubr.msk.f32.mxu0 %vm1173_vm2, %v1171_v1 }
 0x206   :  { %1045 = vmatprep.subr.bf16.mxu0 %v1172_v2 }
 0x21b   :  { %v526_v10 = vpop.f32.mrb[2].mxu1 }
 0x21c   :  { %v904_v11 = vmul.f32 -1.442695, %v526_v10  ;;  %v988_v12 = vpop.f32.mrb[3].mxu1 }
 0x21e   :  { %1082 = vpow2.f32 %v904_v11 }
 0x228   :  { %v1083_v13 = vpop.eup %1082 }
 0x229   :  { %v533_v14 = vadd.f32 1.0, %v1083_v13 }
 0x22b   :  { %1084 = vrcp.f32 %v533_v14 }
 0x235   :  { %v1085_v15 = vpop.eup %1084 }
 0x236   :  { %v536_v16 = vmul.f32 %v1085_v15, %v526_v10 }
 0x238   :  { %994 = vmatmul.mubr.msk.f32.vlgmr.msra.gmra.mrb[6].mxu0 %vm72_vm3, %v536_v16 }
 0x239   :  { %1000 = vmatprep.mubr.msk.f32.mxu0 %vm1173_vm2, %v1171_v1  ;;  %1047 = vmatpush3.bf16.msra.mxu0 %v1046_v19 }
 0x23a   :  { %1051 = vmatprep.subr.bf16.mxu0 %v1172_v2  ;;  %v701_v2 = vld [vmem:[%s1388_s8] sm:$0xff]  ;;  %s1175_s8 = smov [#allocation7]  }
 0x23b   :  { %v1049_v30 = vpack.c.bf16 %v702_v29, %v701_v2  ;;  %s864_s25 = sshll.u32 %s1175_s8, 4  ;;  %s865_s25 = int_to_ptr.vmem [resolvable:$true] %s864_s25 }
 0x23c   :  { %s1120_s26 = scalar_lea.vmem %s865_s25, 256  ;;  %p1125_p9 = scmp.lt.s32.totalorder %s865_s25, %s865_s25 }
 0x23d   :  { %1050 = vmatpush3.bf16.msra.mxu1 %v1049_v30  ;;  %p1121_p8 = scmp.ne.s32.totalorder %s865_s25, %s1120_s26  ;;  %p1126_p10 = scmp.lt.s32.totalorder %s1120_s26, %s1120_s26 }
 0x23f   :  { %p1127_p11 = por %p1126_p10, %p1125_p9 }
 0x241   :  { %p1128_p12 = pnand %p1127_p11, %p1121_p8 }
 0x2d7   :  { %v977_v20 = vpop.f32.mrb[4].mxu0 }
 0x2d8   :  { %436 = vst [vmem:[#allocation7 + $0x8] sm:$0xff] %v977_v20  ;;  %v426_v21 = vpop.f32.mrb[5].mxu0 }
 0x2d9   :  { %435 = vst [vmem:[#allocation7] sm:$0xff] %v426_v21 }
 0x30b   :  { %v608_v22 = vpop.f32.mrb[6].mxu0 }
 0x30c   :  { %v906_v23 = vmul.f32 -1.442695, %v608_v22  ;;  %v995_v24 = vpop.f32.mrb[7].mxu0 }
 0x30e   :  { %1086 = vpow2.f32 %v906_v23 }
 0x318   :  { %v1087_v25 = vpop.eup %1086 }
 0x319   :  { %v615_v26 = vadd.f32 1.0, %v1087_v25 }
 0x31b   :  { %1088 = vrcp.f32 %v615_v26 }
 0x325   :  { %v1089_v27 = vpop.eup %1088 }
 0x326   :  { %v618_v28 = vmul.f32 %v1089_v27, %v608_v22 }
 0x328   :  { %1001 = vmatmul.mubr.msk.f32.vlgmr.msra.gmra.mrb[8].mxu0 %vm72_vm3, %v618_v28 }
 0x329   :  { %1014 = vmatprep.mubr.msk.f32.mxu0 %vm1173_vm2, %v1171_v1  ;;  %v783_v1 = vld [vmem:[%s1389_s9] sm:$0xff] }
 0x32a   :  { %v1052_v39 = vpack.c.bf16 %v784_v38, %v783_v1 }
 0x32c   :  { %1053 = vmatpush3.bf16.msra.mxu0 %v1052_v39 }
 0x3fb   :  { %v690_v31 = vpop.f32.mrb[8].mxu0 }
 0x3fc   :  { %v908_v32 = vmul.f32 -1.442695, %v690_v31  ;;  %v1002_v33 = vpop.f32.mrb[9].mxu0 }
 0x3fe   :  { %1090 = vpow2.f32 %v908_v32 }
 0x408   :  { %v1091_v34 = vpop.eup %1090 }
 0x409   :  { %v697_v35 = vadd.f32 1.0, %v1091_v34 }
 0x40b   :  { %1092 = vrcp.f32 %v697_v35 }
 0x415   :  { %v1093_v36 = vpop.eup %1092 }
 0x416   :  { %v700_v37 = vmul.f32 %v1093_v36, %v690_v31 }
 0x418   :  { %1008 = vmatmul.mubr.msk.f32.vlgmr.msra.gmra.mrb[4].mxu1 %vm72_vm3, %v700_v37 }
 0x4eb   :  { %v772_v40 = vpop.f32.mrb[4].mxu1 }
 0x4ec   :  { %v910_v41 = vmul.f32 -1.442695, %v772_v40  ;;  %v1009_v42 = vpop.f32.mrb[5].mxu1 }
 0x4ee   :  { %1094 = vpow2.f32 %v910_v41 }
 0x4f8   :  { %v1095_v43 = vpop.eup %1094 }
 0x4f9   :  { %v779_v44 = vadd.f32 1.0, %v1095_v43 }
 0x4fb   :  { %1096 = vrcp.f32 %v779_v44 }
 0x505   :  { %v1097_v45 = vpop.eup %1096 }
 0x506   :  { %v782_v46 = vmul.f32 %v1097_v45, %v772_v40 }
 0x508   :  { %1015 = vmatmul.mubr.msk.f32.vlgmr.msra.gmra.mrb[10].mxu0 %vm72_vm3, %v782_v46 }
 0x509   :  { %1131 = shalt.err (!%p1128_p12)
}
 0x50a   :  { %s1132_s3 = scalar_lea.hbm %s1390_s10, 256 }
 0x50b   :  { %p1133_p13 = scmp.ne.s32.totalorder %s1390_s10, %s1132_s3  ;;  %p1136_p0 = scmp.lt.u32.totalorder %s1132_s3, %s1390_s10 }
 0x50d   :  { %p1138_p1 = pnand %p1136_p0, %p1133_p13 }
 0x50f   :  { %1141 = shalt.err (!%p1138_p1)
}
 0x510   :  { %s1176_s30 = smov 128   ;;  %s1177_s12 = smov 8  }
 0x511   :  { %870 = dma.vmem_to_hbm [thread:$0]  %s865_s25, 256, %s1390_s10, [#allocation6], %s1176_s30, %s1176_s30, %s1177_s12  }
 0x512   :  { %s1178_s15 = smov [#allocation8]  }
 0x513   :  { %s877_s4 = sshll.u32 %s1178_s15, 4  ;;  %s878_s4 = int_to_ptr.vmem [resolvable:$true] %s877_s4 }
 0x514   :  { %s1142_s16 = scalar_lea.vmem %s878_s4, 128  ;;  %p1147_p3 = scmp.lt.s32.totalorder %s878_s4, %s878_s4 }
 0x515   :  { %p1143_p2 = scmp.ne.s32.totalorder %s878_s4, %s1142_s16  ;;  %p1148_p4 = scmp.lt.s32.totalorder %s1142_s16, %s1142_s16 }
 0x517   :  { %p1149_p5 = por %p1148_p4, %p1147_p3 }
 0x519   :  { %p1150_p6 = pnand %p1149_p5, %p1143_p2 }
 0x5db   :  { %v854_v47 = vpop.f32.mrb[10].mxu0 }
 0x5dc   :  { %858 = vst [vmem:[#allocation8] sm:$0xff] %v854_v47  ;;  %v1016_v48 = vpop.f32.mrb[11].mxu0 }
 0x5dd   :  { %1153 = shalt.err (!%p1150_p6)
}
 0x5de   :  { %s1154_s18 = scalar_lea.hbm %s1391_s11, 128 }
 0x5df   :  { %p1155_p7 = scmp.ne.s32.totalorder %s1391_s11, %s1154_s18  ;;  %p1158_p8 = scmp.lt.u32.totalorder %s1154_s18, %s1391_s11 }
 0x5e1   :  { %p1160_p9 = pnand %p1158_p8, %p1155_p7 }
 0x5e3   :  { %1163 = shalt.err (!%p1160_p9)
}
 0x5e4   :  { %880 = dma.vmem_to_hbm [thread:$0]  %s878_s4, 128, %s1391_s11, [#allocation9]  }
 0x5e5   :  { %1166 = dma.done.wait [#allocation6], 256  }
 0x5e6   :  { %1167 = vsyncadd [#allocation6], 4294967040 }
 0x5e7   :  { %1168 = dma.done.wait [#allocation9], 128  }
 0x5e8   :  { %1169 = vsyncadd [#allocation9], 4294967168 }
 0x5e9   :  { %887 = vsyncpa [#allocation5], 1 }
 0x5ea   :  { %888 = vsyncpa [#allocation6], 1 }
 0x5eb   :  { %889 = vsyncpa [#allocation9], 1 }

</bundles_post_ra>
